<compile_context>
chip_gen: v7x
topology: tpu7x:2x2x1
jax: 0.10.0
libtpu: 0.0.40
codegen_flags: <defaults>
</compile_context>

<pallas_src>
import functools

import jax
import jax.numpy as jnp
from jax.experimental import pallas as pl
from jax.experimental.pallas import tpu as pltpu

LANES = 128        # linear-layer feature dim == TPU lane width
MAX_B_TILE = 512   # rows per grid step (sublane-aligned, VMEM-cheap)


def _pick_b_tile(n):
    """Largest useful batch tile: multiple of 8, <=512, and (when n allows)
    small enough that the batch grid has >=2 steps so the "parallel" axis can
    shard across both v7x TensorCores."""
    half = (n + 1) // 2
    bt = ((half + 7) // 8) * 8
    return max(8, min(MAX_B_TILE, bt))


def netd_q_kernel(x_ref, w_ref, b_ref, o_ref, *, nd):
    """x_ref: (B_TILE, 128); w_ref: (128, 128); b_ref: (1, 128); o_ref: (B_TILE, nd)."""
    # MXU matmul in the input dtype with f32 accumulation.
    logits = jnp.dot(x_ref[...], w_ref[...],
                     preferred_element_type=jnp.float32) + b_ref[...]

    # Masked log-softmax over the first `nd` (real) columns only; padded weight
    # columns are zero and must not contribute to the normalizer.
    col = jax.lax.broadcasted_iota(jnp.int32, logits.shape, 1)
    valid = col < nd
    masked = jnp.where(valid, logits, -jnp.inf)
    m = jnp.max(masked, axis=-1, keepdims=True)
    e = jnp.where(valid, jnp.exp(logits - m), 0.0)
    lse = jnp.log(jnp.sum(e, axis=-1, keepdims=True)) + m

    # Store only the real nd columns (narrow output block -> minimal HBM writeback).
    o_ref[...] = (logits - lse)[:, :nd].astype(o_ref.dtype)


@functools.partial(jax.jit, static_argnames=("nd",))
def netd_q_forward(x, weight, bias, *, nd):
    """PyTorch-equivalent forward.

    x      : any shape reshapeable to (-1, 128) (e.g. (N, 128, 1, 1))
    weight : (nd, 128)   -- torch.nn.Linear weight layout
    bias   : (nd,)
    returns (N, nd, 1, 1) log-probabilities in x.dtype.
    """
    assert nd <= LANES, f"nd={nd} must be <= {LANES} (compute padding assumes this)"

    x2 = x.reshape(-1, LANES)          # pure metadata reshape, no layout round-trip
    n = x2.shape[0]
    b_tile = _pick_b_tile(n)

    # Keep the weight in the MXU-native operand dtype when x is bf16; else f32.
    w_dtype = jnp.bfloat16 if x2.dtype == jnp.bfloat16 else jnp.float32
    w_pad = jnp.zeros((LANES, LANES), w_dtype).at[:, :nd].set(
        weight.T.astype(w_dtype))
    b_pad = jnp.zeros((1, LANES), jnp.float32).at[0, :nd].set(
        bias.astype(jnp.float32))

    out = pl.pallas_call(
        functools.partial(netd_q_kernel, nd=nd),
        out_shape=jax.ShapeDtypeStruct((n, nd), x.dtype),
        grid_spec=pltpu.PrefetchScalarGridSpec(
            num_scalar_prefetch=0,
            grid=(pl.cdiv(n, b_tile),),
            in_specs=[
                pl.BlockSpec((b_tile, LANES), lambda i: (i, 0)),
                pl.BlockSpec((LANES, LANES), lambda i: (0, 0)),
                pl.BlockSpec((1, LANES), lambda i: (0, 0)),
            ],
            out_specs=pl.BlockSpec((b_tile, nd), lambda i: (i, 0)),
        ),
        compiler_params=pltpu.CompilerParams(
            dimension_semantics=("parallel",)),
    )(x2, w_pad, b_pad)

    return out.reshape(-1, nd, 1, 1)


def reference_forward(x, weight, bias, nd):
    """Plain-JAX reference mirroring the PyTorch forward."""
    x2 = x.reshape(-1, LANES)
    logits = x2 @ weight.T + bias
    return jax.nn.log_softmax(logits, axis=-1).reshape(-1, nd, 1, 1)


if __name__ == "__main__":
    N, ND = 2, 10

    key = jax.random.PRNGKey(0)
    kx, kw, kb = jax.random.split(key, 3)

    x = jax.random.normal(kx, (N, 128, 1, 1), dtype=jnp.float32)

    # PyTorch-style Linear init: U(-k, k), k = 1/sqrt(fan_in).
    k = 1.0 / jnp.sqrt(jnp.float32(LANES))
    weight = jax.random.uniform(kw, (ND, LANES), jnp.float32, -k, k)
    bias = jax.random.uniform(kb, (ND,), jnp.float32, -k, k)

    out = netd_q_forward(x, weight, bias, nd=ND)
    out = jax.block_until_ready(out)

    ref = reference_forward(x, weight, bias, ND)
    assert out.shape == (N, ND, 1, 1), out.shape
    assert jnp.allclose(out, ref, atol=1e-5, rtol=1e-5), (
        float(jnp.max(jnp.abs(out - ref))))

    print("KERNEL_OK")
</pallas_src>

<mosaic_0001>
module attributes {stable_mosaic.version = 11 : i64} {
  func.func @netd_q_kernel(%arg0: i32, %arg1: memref<8x128xf32, #tpu.memory_space<vmem>>, %arg2: memref<128x128xf32, #tpu.memory_space<vmem>>, %arg3: memref<1x128xf32, #tpu.memory_space<vmem>>, %arg4: memref<8x10xf32, #tpu.memory_space<vmem>>) attributes {dimension_semantics = [#tpu.dimension_semantics<parallel>], iteration_bounds = array<i64: 1>, scalar_prefetch = 0 : i64, scratch_operands = 0 : i64, tpu.core_type = #tpu.core_type<tc>, window_params = [{transform_indices = @transform_0, window_bounds = array<i64: 8, 128>}, {pipeline_mode = #tpu.pipeline_mode<synchronous>, transform_indices = @transform_1, window_bounds = array<i64: 128, 128>}, {pipeline_mode = #tpu.pipeline_mode<synchronous>, transform_indices = @transform_2, window_bounds = array<i64: 1, 128>}, {transform_indices = @transform_3, window_bounds = array<i64: 8, 10>}]} {
    %c0 = arith.constant 0 : index
    %c0_0 = arith.constant 0 : index
    %0 = vector.load %arg1[%c0, %c0_0] : memref<8x128xf32, #tpu.memory_space<vmem>>, vector<8x128xf32>
    %c0_1 = arith.constant 0 : index
    %c0_2 = arith.constant 0 : index
    %1 = vector.load %arg2[%c0_1, %c0_2] : memref<128x128xf32, #tpu.memory_space<vmem>>, vector<128x128xf32>
    %cst = arith.constant dense<0.000000e+00> : vector<8x128xf32>
    %2 = tpu.matmul %0, %1, %cst {dimension_numbers = #tpu.dot_dimension_numbers<[1], [0], [0], [1], [0, 0, 1, 1], [], []>} : vector<8x128xf32>, vector<128x128xf32>, vector<8x128xf32> -> vector<8x128xf32>
    %c0_3 = arith.constant 0 : index
    %c0_4 = arith.constant 0 : index
    %3 = vector.load %arg3[%c0_3, %c0_4] : memref<1x128xf32, #tpu.memory_space<vmem>>, vector<1x128xf32>
    %4 = vector.broadcast %3 : vector<1x128xf32> to vector<8x128xf32>
    %5 = arith.addf %2, %4 : vector<8x128xf32>
    %6 = tpu.iota {dimensions = array<i32: 1>} : vector<8x128xi32>
    %c10_i32 = arith.constant 10 : i32
    %7 = vector.broadcast %c10_i32 : i32 to vector<8x128xi32>
    %8 = arith.cmpi slt, %6, %7 : vector<8x128xi32>
    %cst_5 = arith.constant 0xFF800000 : f32
    %9 = vector.broadcast %cst_5 : f32 to vector<8x128xf32>
    %10 = arith.select %8, %5, %9 : vector<8x128xi1>, vector<8x128xf32>
    %cst_6 = arith.constant dense<0xFF800000> : vector<8xf32>
    %11 = vector.multi_reduction <maximumf>, %10, %cst_6 [1] : vector<8x128xf32> to vector<8xf32>
    %12 = vector.shape_cast %11 : vector<8xf32> to vector<8x1xf32>
    %13 = vector.broadcast %12 : vector<8x1xf32> to vector<8x128xf32>
    %14 = arith.subf %5, %13 : vector<8x128xf32>
    %15 = math.exp %14 : vector<8x128xf32>
    %cst_7 = arith.constant 0.000000e+00 : f32
    %16 = vector.broadcast %cst_7 : f32 to vector<8x128xf32>
    %17 = arith.select %8, %15, %16 : vector<8x128xi1>, vector<8x128xf32>
    %cst_8 = arith.constant dense<0.000000e+00> : vector<8xf32>
    %18 = vector.multi_reduction <add>, %17, %cst_8 [1] : vector<8x128xf32> to vector<8xf32>
    %19 = vector.shape_cast %18 : vector<8xf32> to vector<8x1xf32>
    %20 = math.log %19 : vector<8x1xf32>
    %21 = arith.addf %20, %12 : vector<8x1xf32>
    %22 = vector.broadcast %21 : vector<8x1xf32> to vector<8x128xf32>
    %23 = arith.subf %5, %22 : vector<8x128xf32>
    %24 = vector.extract_strided_slice %23 {offsets = [0, 0], sizes = [8, 10], strides = [1, 1]} : vector<8x128xf32> to vector<8x10xf32>
    %c0_9 = arith.constant 0 : index
    %c0_10 = arith.constant 0 : index
    %25 = vector.load %arg4[%c0_9, %c0_10] : memref<8x10xf32, #tpu.memory_space<vmem>>, vector<8x10xf32>
    tpu.vector_store %arg4[%c0_9, %c0_10], %24 {strides = array<i32>} : memref<8x10xf32, #tpu.memory_space<vmem>>, vector<8x10xf32>,
    return
  }
  func.func @transform_0(%arg0: i32) -> (i32, i32) {
    %c0_i32 = arith.constant 0 : i32
    %c0_i32_0 = arith.constant 0 : i32
    return %arg0, %c0_i32 : i32, i32
  }
  func.func @transform_1(%arg0: i32) -> (i32, i32) {
    %c0_i32 = arith.constant 0 : i32
    %c0_i32_0 = arith.constant 0 : i32
    %c0_i32_1 = arith.constant 0 : i32
    return %c0_i32, %c0_i32_0 : i32, i32
  }
  func.func @transform_2(%arg0: i32) -> (i32, i32) {
    %c0_i32 = arith.constant 0 : i32
    %c0_i32_0 = arith.constant 0 : i32
    %c0_i32_1 = arith.constant 0 : i32
    return %c0_i32, %c0_i32_0 : i32, i32
  }
  func.func @transform_3(%arg0: i32) -> (i32, i32) {
    %c0_i32 = arith.constant 0 : i32
    %c0_i32_0 = arith.constant 0 : i32
    return %arg0, %c0_i32 : i32, i32
  }
}

</mosaic_0001>

<bundles_post_ra>
// kernel: netd_q_forward.1
= control target key start
LH: loop header
LB: loop body
LE: loop exit
PB: predicated region body
PF: predicated region fallthrough
CT: control target
= control target key end

     0   :  { %8 = vsyncpa [#allocation3], 0  ;;  %v254_v2 = vmov 0.0|0.0   ;;  %vm255_vm0 = vmmov 0   ;;  %v256_v6 = vmov 0.0   ;;  %v109_v27 = vlaneseq  ;;  %s346_s0 = inlined_call_operand.vmem [shape: f32[2,128], index: 0, kind: input, shape index: {}]   ;;  %s347_s1 = inlined_call_operand.vmem [shape: f32[128,128], index: 1, kind: input, shape index: {}]   ;;  %s348_s2 = inlined_call_operand.vmem [shape: f32[1,128], index: 2, kind: input, shape index: {}]   ;;  %s349_s3 = inlined_call_operand.hbm [shape: f32[2,10], index: 3, kind: output, shape index: {}]  }
   0x1   :  { %v16_v0 = vld [vmem:[%s347_s1] sm:$0xff]  ;;  %v17_v1 = vld [vmem:[%s347_s1 + $0x8] sm:$0xff]  ;;  %196 = vmatprep.subr.bf16.mxu0 %v254_v2  ;;  %v18_v4 = vld [vmem:[%s347_s1 + $0x10] sm:$0xff]  ;;  %193 = vmatprep.mubr.msk.f32.mxu0 %vm255_vm0, %v256_v6  ;;  %vm125_vm2 = vcmask 80896  }
   0x2   :  { %v197_v3 = vpack.c.bf16 %v17_v1, %v16_v0  ;;  %v19_v5 = vld [vmem:[%s347_s1 + $0x18] sm:$0xff]  ;;  %v20_v8 = vld [vmem:[%s347_s1 + $0x20] sm:$0xff]  ;;  %v21_v9 = vld [vmem:[%s347_s1 + $0x28] sm:$0xff]  ;;  %v110_v28 = vand.u32 127, %v109_v27 }
   0x3   :  { %v200_v7 = vpack.c.bf16 %v19_v5, %v18_v4  ;;  %v203_v10 = vpack.c.bf16 %v21_v9, %v20_v8  ;;  %v22_v11 = vld [vmem:[%s347_s1 + $0x30] sm:$0xff]  ;;  %v23_v12 = vld [vmem:[%s347_s1 + $0x38] sm:$0xff]  ;;  %v24_v14 = vld [vmem:[%s347_s1 + $0x40] sm:$0xff] }
   0x4   :  { %198 = vmatpush3.bf16.msra.mxu0 %v197_v3  ;;  %v206_v13 = vpack.c.bf16 %v23_v12, %v22_v11  ;;  %v25_v15 = vld [vmem:[%s347_s1 + $0x48] sm:$0xff]  ;;  %v26_v17 = vld [vmem:[%s347_s1 + $0x50] sm:$0xff]  ;;  %v27_v18 = vld [vmem:[%s347_s1 + $0x58] sm:$0xff]  ;;  %vm111_vm1 = vcmp.lt.s32.totalorder %v110_v28, 10 }
   0x5   :  { %199 = vmatprep.subr.bf16.mxu0 %v254_v2  ;;  %v209_v16 = vpack.c.bf16 %v25_v15, %v24_v14  ;;  %v212_v19 = vpack.c.bf16 %v27_v18, %v26_v17  ;;  %v28_v20 = vld [vmem:[%s347_s1 + $0x60] sm:$0xff]  ;;  %v29_v21 = vld [vmem:[%s347_s1 + $0x68] sm:$0xff]  ;;  %v30_v23 = vld [vmem:[%s347_s1 + $0x70] sm:$0xff] }
   0x6   :  { %v215_v22 = vpack.c.bf16 %v29_v21, %v28_v20  ;;  %v31_v24 = vld [vmem:[%s347_s1 + $0x78] sm:$0xff]  ;;  %v15_v26 = vld [vmem:[%s346_s0] sm:$0xff] }
   0x7   :  { %v218_v25 = vpack.c.bf16 %v31_v24, %v30_v23  ;;  %v143_v29 = vld [vmem:[%s348_s2] ss:$0 sm:$0xff] }
   0x8   :  { %201 = vmatpush3.bf16.msra.mxu0 %v200_v7 }
   0x9   :  { %202 = vmatprep.subr.bf16.mxu0 %v254_v2 }
   0xc   :  { %204 = vmatpush3.bf16.msra.mxu0 %v203_v10 }
   0xd   :  { %205 = vmatprep.subr.bf16.mxu0 %v254_v2 }
  0x10   :  { %207 = vmatpush3.bf16.msra.mxu0 %v206_v13 }
  0x11   :  { %208 = vmatprep.subr.bf16.mxu0 %v254_v2 }
  0x14   :  { %210 = vmatpush3.bf16.msra.mxu0 %v209_v16 }
  0x15   :  { %211 = vmatprep.subr.bf16.mxu0 %v254_v2 }
  0x18   :  { %213 = vmatpush3.bf16.msra.mxu0 %v212_v19 }
  0x19   :  { %214 = vmatprep.subr.bf16.mxu0 %v254_v2 }
  0x1c   :  { %216 = vmatpush3.bf16.msra.mxu0 %v215_v22 }
  0x1d   :  { %217 = vmatprep.subr.bf16.mxu0 %v254_v2 }
  0x20   :  { %219 = vmatpush3.bf16.msra.mxu0 %v218_v25 }
  0x23   :  { %194 = vmatmul.mubr.f32.vlgmr.msra.gmra.mrb[0].mxu0 %v15_v26 }
  0xf6   :  { %v105_v30 = vpop.f32.mrb[0].mxu0 }
  0xf7   :  { %v106_v31 = vadd.f32 %v143_v29, %v105_v30  ;;  %v195_v32 = vpop.f32.mrb[1].mxu0 }
  0xf9   :  { %v112_v33 = vsel %vm111_vm1, %v106_v31, -inf }
  0xfa   :  { %113 = vmax.xlane.f32.xlu0 %v112_v33 }
 0x187   :  { %v114_v34 = vpop.xlane.xlu0 %113 }
 0x188   :  { %v115_v35 = vsub.f32 %v106_v31, %v114_v34 }
 0x18a   :  { %v116_v36 = vmul.f32 1.442695, %v115_v35 }
 0x18c   :  { %226 = vpow2.f32 %v116_v36 }
 0x196   :  { %v227_v37 = vpop.eup %226 }
 0x197   :  { %v118_v38 = vsel %vm111_vm1, %v227_v37, 0.0 }
 0x198   :  { %119 = vadd.xlane.f32.xlu0 %v118_v38 }
 0x225   :  { %v120_v39 = vpop.xlane.xlu0 %119 }
 0x226   :  { %228 = vlog2.f32 %v120_v39 }
 0x230   :  { %v229_v40 = vpop.eup %228 }
 0x231   :  { %v122_v41 = vmul.f32 0.6931472, %v229_v40 }
 0x233   :  { %v123_v42 = vadd.f32 %v122_v41, %v114_v34 }
 0x235   :  { %v124_v43 = vsub.f32 %v106_v31, %v123_v42 }
 0x237   :  { %126 = vst.msk [vmem:[#allocation2] sm:$0xff] %vm125_vm2, %v124_v43 }
 0x238   :  { %131 = vsyncadd [#allocation3], 96  ;;  %s257_s0 = smov [#allocation2]  }
 0x239   :  { %s132_s1 = sshll.u32 %s257_s0, 4  ;;  %s133_s1 = int_to_ptr.vmem [resolvable:$true] %s132_s1 }
 0x23a   :  { %s230_s2 = scalar_lea.vmem %s133_s1, 32  ;;  %s234_s21 = scalar_lea.vmem %s133_s1, 128 }
 0x23b   :  { %p231_p0 = scmp.ne.s32.totalorder %s133_s1, %s230_s2  ;;  %p235_p1 = scmp.lt.s32.totalorder %s133_s1, %s133_s1 }
 0x23c   :  { %p236_p2 = scmp.lt.s32.totalorder %s234_s21, %s230_s2 }
 0x23e   :  { %p237_p3 = por %p236_p2, %p235_p1 }
 0x240   :  { %p238_p4 = pnand %p237_p3, %p231_p0 }
 0x242   :  { %241 = shalt.err (!%p238_p4)
}
 0x243   :  { %s242_s24 = scalar_lea.hbm %s349_s3, 32 }
 0x244   :  { %p243_p5 = scmp.ne.s32.totalorder %s349_s3, %s242_s24  ;;  %p246_p6 = scmp.lt.u32.totalorder %s242_s24, %s349_s3 }
 0x246   :  { %p248_p7 = pnand %p246_p6, %p243_p5 }
 0x248   :  { %251 = shalt.err (!%p248_p7)
}
 0x249   :  { %s258_s29 = smov 32   ;;  %s259_s30 = smov 2  }
 0x24a   :  { %138 = dma.vmem_to_hbm [thread:$0]  %s133_s1, 32, %s349_s3, [#allocation3], %s258_s29, %s258_s29, %s259_s30  }
 0x24b   :  { %252 = dma.done.wait [#allocation3], 128  }
 0x24c   :  { %253 = vsyncadd [#allocation3], 4294967168 }
 0x24d   :  { %142 = vsyncpa [#allocation3], 1 }

</bundles_post_ra>
